<compile_context>
chip_gen: v5e
topology: v5e:2x2
jax: 0.10.0
libtpu: 0.0.40
codegen_flags: <defaults>
</compile_context>

<pallas_src>
import functools

import jax
import jax.numpy as jnp
from jax.experimental import pallas as pl
from jax.experimental.pallas import tpu as pltpu

_LANE = 128
_SUBLANE = 8


def _contrastive_loss_kernel(sim_ref, lab_ref, out_ref, acc_ref, *, margin):
    # grid = (num_splits ["parallel"], steps_per_split ["arbitrary"])
    i = pl.program_id(1)

    @pl.when(i == 0)
    def _():
        acc_ref[...] = jnp.zeros_like(acc_ref)

    sim = sim_ref[...].astype(jnp.float32)
    lab = lab_ref[...].astype(jnp.float32)

    # Exact module semantics (also correct for soft / non-binary labels):
    #   (1 - label) * sim^2 + label * clamp(margin - sim, 0)^2
    hinge = jnp.maximum(margin - sim, 0.0)
    term = (1.0 - lab) * (sim * sim) + lab * (hinge * hinge)

    # Reduce the block onto the (8, W) accumulator slab.  The reshape only
    # splits the sublane-group (row) axis -- the minor (8, W) layout is
    # unchanged -- so the leading-axis sum is pure VALU vreg adds (no XLU).
    r, w = term.shape
    acc_ref[...] += jnp.sum(term.reshape(r // _SUBLANE, _SUBLANE, w), axis=0)

    @pl.when(i == pl.num_programs(1) - 1)
    def _():
        # Single cross-lane/sublane reduction per split (<= 8 vregs),
        # broadcast into this split's aligned (8, 128) output tile.
        total = jnp.sum(acc_ref[...])
        out_ref[...] = jnp.full((_SUBLANE, _LANE), total, dtype=jnp.float32)


def _default_target_block_bytes():
    """~2 MiB blocks on v5e/v6e (already ~89-93% of HBM roofline there and
    safe under the 16 MiB v5e scoped-VMEM default); ~4 MiB on v7x to amortize
    the fixed per-step overhead against its ~3.2 TB/s HBM."""
    try:
        kind = jax.devices()[0].device_kind.lower()
    except Exception:
        kind = ""
    if "v7" in kind or "7x" in kind:
        return 4 * 1024 * 1024
    return 2 * 1024 * 1024


def _pick_width(total):
    """Largest lane-dense width W (multiple of 128) with total == rows * W and
    rows a multiple of 8; prefer leaving >= 32 rows so multi-step pipelining
    and the 2-way split remain available."""
    candidates = (1024, 512, 256, 128)
    valid = [w for w in candidates if total % (w * _SUBLANE) == 0]
    for w in valid:
        if total // w >= 32:
            return w
    return valid[0]


def _pick_tiling(rows, max_rows):
    """Largest row tile (multiple of 8, divides rows, <= max_rows).  Prefer a
    tile that yields an even step count (enables the 2-way 'parallel' split
    for v7x megacore) unless that would shrink the tile by more than 4x."""
    limit = min(rows, max(_SUBLANE, max_rows))
    largest = _SUBLANE
    largest_even = None
    d = _SUBLANE
    while d <= limit:
        if rows % d == 0:
            largest = d
            if (rows // d) % 2 == 0:
                largest_even = d
        d += _SUBLANE
    if largest_even is not None and largest_even * 4 >= largest:
        return largest_even, 2
    return largest, 1


def contrastive_loss(similarity, label, margin=2.0, *,
                     target_block_bytes=None):
    """Contrastive loss via a Pallas TPU kernel.

    similarity / label: arrays of identical shape whose total element count is
    a multiple of 1024 (= 8*128).  Any numeric dtypes (cast to f32 in-kernel);
    passing narrow dtypes (bf16 similarity, bf16/int8 labels) cuts HBM traffic
    for this memory-bound kernel.  Returns a scalar float32 loss.
    """
    assert similarity.shape == label.shape
    total = 1
    for s in similarity.shape:
        total *= int(s)
    assert total % (_SUBLANE * _LANE) == 0, (
        "total element count must be a multiple of 1024 (8*128)")
    # TODO(synk): add a padded/masked path for totals not divisible by 1024.

    if target_block_bytes is None:
        target_block_bytes = _default_target_block_bytes()

    # Flatten to a lane-dense 2D shape (free at the XLA level for contiguous
    # row-major data); the elementwise + full-sum math is layout-agnostic.
    W = _pick_width(total)
    rows = total // W
    sim2 = similarity.reshape(rows, W)
    lab2 = label.reshape(rows, W)

    # Row tile sized so the similarity block is ~target_block_bytes.
    sim_row_bytes = W * jnp.dtype(similarity.dtype).itemsize
    max_rows = max(_SUBLANE, target_block_bytes // max(1, sim_row_bytes))
    tile_rows, num_splits = _pick_tiling(rows, max_rows)
    steps = (rows // tile_rows) // num_splits

    # Explicit scoped-VMEM limit from the actual footprint (2 inputs x 2
    # pipeline buffers + (8, W) accumulator + output tiles), with headroom,
    # capped well under v7x's 64 MiB physical VMEM.
    bytes_per_elem = (jnp.dtype(similarity.dtype).itemsize
                      + jnp.dtype(label.dtype).itemsize)
    footprint = (2 * tile_rows * W * bytes_per_elem
                 + _SUBLANE * W * 4
                 + 2 * _SUBLANE * _LANE * 4)
    vmem_limit = int(min(48 << 20, max(16 << 20, 2 * footprint)))

    kernel = functools.partial(_contrastive_loss_kernel, margin=float(margin))

    partials = pl.pallas_call(
        kernel,
        out_shape=jax.ShapeDtypeStruct((num_splits * _SUBLANE, _LANE),
                                       jnp.float32),
        grid=(num_splits, steps),
        in_specs=[
            pl.BlockSpec((tile_rows, W), lambda s, i: (s * steps + i, 0)),
            pl.BlockSpec((tile_rows, W), lambda s, i: (s * steps + i, 0)),
        ],
        out_specs=pl.BlockSpec((_SUBLANE, _LANE), lambda s, i: (s, 0)),
        scratch_shapes=[pltpu.VMEM((_SUBLANE, W), jnp.float32)],
        compiler_params=pltpu.CompilerParams(
            dimension_semantics=("parallel", "arbitrary"),
            vmem_limit_bytes=vmem_limit,
        ),
    )(sim2, lab2)

    # One scalar lives (broadcast) in each split's (8, 128) tile.
    per_split = partials[0::_SUBLANE, 0]
    return jnp.sum(per_split) / jnp.float32(total)


if __name__ == "__main__":
    key = jax.random.PRNGKey(0)
    k_sim, k_lab, k_sim2, k_lab2 = jax.random.split(key, 4)

    margin = 2.0

    def reference(sim, lab):
        sim = sim.astype(jnp.float32)
        lab = lab.astype(jnp.float32)
        hinge = jnp.maximum(margin - sim, 0.0)
        return jnp.mean((1.0 - lab) * sim ** 2 + lab * hinge ** 2)

    # Check 1: small shape, float32 labels (single block, single split).
    B, D = 16, 128
    sim = jax.random.normal(k_sim, (B, D), dtype=jnp.float32)
    lab = jax.random.bernoulli(k_lab, p=0.5, shape=(B, D)).astype(jnp.float32)
    loss = jax.block_until_ready(contrastive_loss(sim, lab, margin=margin))
    ref = reference(sim, lab)
    assert jnp.allclose(loss, ref, rtol=1e-5, atol=1e-6), (loss, ref)

    # Check 2: narrower label dtype (bf16) — less HBM traffic; exact for 0/1
    # labels since the kernel casts to f32 internally.
    lab_bf16 = lab.astype(jnp.bfloat16)
    loss_bf16 = jax.block_until_ready(
        contrastive_loss(sim, lab_bf16, margin=margin))
    assert jnp.allclose(loss_bf16, ref, rtol=1e-5, atol=1e-6), (loss_bf16, ref)

    # Check 3: multi-step reduction + 2-way "parallel" batch split, forced by
    # a tiny block-byte target (exercises accumulator init/finalize per split
    # and the per-split output tiles).
    B2, D2 = 64, 128
    sim_b = jax.random.normal(k_sim2, (B2, D2), dtype=jnp.float32)
    lab_b = jax.random.bernoulli(k_lab2, p=0.5, shape=(B2, D2)).astype(
        jnp.float32)
    loss2 = jax.block_until_ready(
        contrastive_loss(sim_b, lab_b, margin=margin,
                         target_block_bytes=8 * 128 * 4))
    ref2 = reference(sim_b, lab_b)
    assert jnp.allclose(loss2, ref2, rtol=1e-5, atol=1e-6), (loss2, ref2)

    print("KERNEL_OK")
</pallas_src>

<mosaic_0001>
module attributes {stable_mosaic.version = 11 : i64} {
  func.func @_contrastive_loss_kernel(%arg0: i32, %arg1: i32, %arg2: memref<8x256xf32, #tpu.memory_space<vmem>>, %arg3: memref<8x256xf32, #tpu.memory_space<vmem>>, %arg4: memref<8x128xf32, #tpu.memory_space<vmem>>, %arg5: memref<8x256xf32, #tpu.memory_space<vmem>>) attributes {dimension_semantics = [#tpu.dimension_semantics<parallel>, #tpu.dimension_semantics<arbitrary>], iteration_bounds = array<i64: 1, 1>, scalar_prefetch = 0 : i64, scratch_operands = 1 : i64, tpu.core_type = #tpu.core_type<tc>, window_params = [{transform_indices = @transform_0, window_bounds = array<i64: 8, 256>}, {transform_indices = @transform_1, window_bounds = array<i64: 8, 256>}, {transform_indices = @transform_2, window_bounds = array<i64: 8, 128>}]} {
    %c0_i32 = arith.constant 0 : i32
    %0 = arith.cmpi eq, %arg1, %c0_i32 : i32
    %1 = arith.extui %0 : i1 to i32
    %c0_i32_0 = arith.constant 0 : i32
    %2 = arith.cmpi ne, %1, %c0_i32_0 : i32
    scf.if %2 {
      %cst_13 = arith.constant 0.000000e+00 : f32
      %24 = vector.broadcast %cst_13 : f32 to vector<8x256xf32>
      %c0_14 = arith.constant 0 : index
      %c0_15 = arith.constant 0 : index
      %25 = vector.load %arg5[%c0_14, %c0_15] : memref<8x256xf32, #tpu.memory_space<vmem>>, vector<8x256xf32>
      tpu.vector_store %arg5[%c0_14, %c0_15], %24 {strides = array<i32>} : memref<8x256xf32, #tpu.memory_space<vmem>>, vector<8x256xf32>,
    } else {
    }
    %c0 = arith.constant 0 : index
    %c0_1 = arith.constant 0 : index
    %3 = vector.load %arg2[%c0, %c0_1] : memref<8x256xf32, #tpu.memory_space<vmem>>, vector<8x256xf32>
    %c0_2 = arith.constant 0 : index
    %c0_3 = arith.constant 0 : index
    %4 = vector.load %arg3[%c0_2, %c0_3] : memref<8x256xf32, #tpu.memory_space<vmem>>, vector<8x256xf32>
    %cst = arith.constant 2.000000e+00 : f32
    %5 = vector.broadcast %cst : f32 to vector<8x256xf32>
    %6 = arith.subf %5, %3 : vector<8x256xf32>
    %cst_4 = arith.constant 0.000000e+00 : f32
    %7 = vector.broadcast %cst_4 : f32 to vector<8x256xf32>
    %8 = arith.maximumf %6, %7 : vector<8x256xf32>
    %cst_5 = arith.constant 1.000000e+00 : f32
    %9 = vector.broadcast %cst_5 : f32 to vector<8x256xf32>
    %10 = arith.subf %9, %4 : vector<8x256xf32>
    %11 = arith.mulf %3, %3 : vector<8x256xf32>
    %12 = arith.mulf %10, %11 : vector<8x256xf32>
    %13 = arith.mulf %8, %8 : vector<8x256xf32>
    %14 = arith.mulf %4, %13 : vector<8x256xf32>
    %15 = arith.addf %12, %14 : vector<8x256xf32>
    %c0_6 = arith.constant 0 : index
    %c0_7 = arith.constant 0 : index
    %16 = vector.load %arg5[%c0_6, %c0_7] : memref<8x256xf32, #tpu.memory_space<vmem>>, vector<8x256xf32>
    %17 = vector.shape_cast %15 : vector<8x256xf32> to vector<1x8x256xf32>
    %cst_8 = arith.constant dense<0.000000e+00> : vector<8x256xf32>
    %18 = vector.multi_reduction <add>, %17, %cst_8 [0] : vector<1x8x256xf32> to vector<8x256xf32>
    %19 = arith.addf %16, %18 : vector<8x256xf32>
    %c0_9 = arith.constant 0 : index
    %c0_10 = arith.constant 0 : index
    %20 = vector.load %arg5[%c0_9, %c0_10] : memref<8x256xf32, #tpu.memory_space<vmem>>, vector<8x256xf32>
    tpu.vector_store %arg5[%c0_9, %c0_10], %19 {strides = array<i32>} : memref<8x256xf32, #tpu.memory_space<vmem>>, vector<8x256xf32>,
    %c0_i32_11 = arith.constant 0 : i32
    %21 = arith.cmpi eq, %arg1, %c0_i32_11 : i32
    %22 = arith.extui %21 : i1 to i32
    %c0_i32_12 = arith.constant 0 : i32
    %23 = arith.cmpi ne, %22, %c0_i32_12 : i32
    scf.if %23 {
      %c0_13 = arith.constant 0 : index
      %c0_14 = arith.constant 0 : index
      %24 = vector.load %arg5[%c0_13, %c0_14] : memref<8x256xf32, #tpu.memory_space<vmem>>, vector<8x256xf32>
      %25 = vector.shape_cast %24 : vector<8x256xf32> to vector<1x8x256xf32>
      %cst_15 = arith.constant dense<0.000000e+00> : vector<1xf32>
      %26 = vector.multi_reduction <add>, %25, %cst_15 [1, 2] : vector<1x8x256xf32> to vector<1xf32>
      %27 = vector.shape_cast %26 : vector<1xf32> to vector<1x1x1xf32>
      %28 = vector.extract %27[0, 0, 0] : f32 from vector<1x1x1xf32>
      %29 = vector.broadcast %28 : f32 to vector<8x128xf32>
      %c0_16 = arith.constant 0 : index
      %c0_17 = arith.constant 0 : index
      %30 = vector.load %arg4[%c0_16, %c0_17] : memref<8x128xf32, #tpu.memory_space<vmem>>, vector<8x128xf32>
      tpu.vector_store %arg4[%c0_16, %c0_17], %29 {strides = array<i32>} : memref<8x128xf32, #tpu.memory_space<vmem>>, vector<8x128xf32>,
    } else {
    }
    return
  }
  func.func @transform_0(%arg0: i32, %arg1: i32) -> (i32, i32) {
    %c1_i32 = arith.constant 1 : i32
    %0 = arith.muli %arg0, %c1_i32 : i32
    %1 = arith.addi %0, %arg1 : i32
    %c0_i32 = arith.constant 0 : i32
    %c0_i32_0 = arith.constant 0 : i32
    return %1, %c0_i32 : i32, i32
  }
  func.func @transform_1(%arg0: i32, %arg1: i32) -> (i32, i32) {
    %c1_i32 = arith.constant 1 : i32
    %0 = arith.muli %arg0, %c1_i32 : i32
    %1 = arith.addi %0, %arg1 : i32
    %c0_i32 = arith.constant 0 : i32
    %c0_i32_0 = arith.constant 0 : i32
    return %1, %c0_i32 : i32, i32
  }
  func.func @transform_2(%arg0: i32, %arg1: i32) -> (i32, i32) {
    %c0_i32 = arith.constant 0 : i32
    %c0_i32_0 = arith.constant 0 : i32
    return %arg0, %c0_i32 : i32, i32
  }
}

</mosaic_0001>

<bundles_post_ra>
// kernel: tpu_custom_call.1
= control target key start
LH: loop header
LB: loop body
LE: loop exit
PB: predicated region body
PF: predicated region fallthrough
CT: control target
= control target key end

     0   :  { %7 = vsyncpa [#allocation4], 0  ;;  %s229_s0 = inlined_call_operand.hbm [shape: f32[8,256], index: 0, kind: input, shape index: {}]   ;;  %s230_s1 = inlined_call_operand.hbm [shape: f32[8,256], index: 1, kind: input, shape index: {}]   ;;  %s231_s2 = inlined_call_operand.hbm [shape: f32[8,128], index: 2, kind: output, shape index: {}]  }
   0x1   :  { %8 = vsyncpa [#allocation7], 0 }
   0x2   :  { %9 = vsyncpa [#allocation5], 0  ;;  %s19_s11 = sshll.u32 %s229_s0, 4  ;;  %s202_s12 = smov [#allocation3]   ;;  %s20_s11 = int_to_ptr.hbm [resolvable:$true] %s19_s11 }
   0x3   :  { %s21_s13 = sshll.u32 %s202_s12, 4  ;;  %s34_s16 = sshll.u32 %s230_s1, 4  ;;  %s22_s13 = int_to_ptr.vmem [resolvable:$true] %s21_s13  ;;  %s35_s16 = int_to_ptr.hbm [resolvable:$true] %s34_s16 }
   0x4   :  { %24 = dma.hbm_to_vmem [thread:$0]  %s20_s11, 256, %s22_s13, [#allocation4]  }
   0x5   :  { %s203_s17 = smov [#allocation6]  }
   0x6   :  { %s36_s18 = sshll.u32 %s203_s17, 4  ;;  %s37_s18 = int_to_ptr.vmem [resolvable:$true] %s36_s18 }
   0x7   :  { %39 = dma.hbm_to_vmem [thread:$0]  %s35_s16, 256, %s37_s18, [#allocation7]  }
   0x8   :  { %196 = dma.done.wait [#allocation4], 256  }
   0x9   :  { %197 = vsyncadd [#allocation4], 4294967040 }
   0xa   :  { %198 = dma.done.wait [#allocation7], 256  }
   0xb   :  { %199 = vsyncadd [#allocation7], 4294967040  ;;  %v56_v0 = vld [vmem:[#allocation3] sm:$0xff]  ;;  %v57_v1 = vld [vmem:[#allocation3 + $0x8] sm:$0xff]  ;;  %s204_s0 = smov [#allocation8]   ;;  %s108_s21 = sshll.u32 %s231_s2, 4  ;;  %s109_s21 = int_to_ptr.hbm [resolvable:$true] %s108_s21 }
   0xc   :  { %v58_v2 = vld [vmem:[#allocation6] sm:$0xff]  ;;  %v59_v3 = vld [vmem:[#allocation6 + $0x8] sm:$0xff]  ;;  %v60_v4 = vsub.f32 2.0, %v56_v0  ;;  %v61_v5 = vsub.f32 2.0, %v57_v1  ;;  %v66_v7 = vmul.f32 %v56_v0, %v56_v0  ;;  %v67_v9 = vmul.f32 %v57_v1, %v57_v1  ;;  %s106_s1 = sshll.u32 %s204_s0, 4  ;;  %s107_s1 = int_to_ptr.vmem [resolvable:$true] %s106_s1 }
   0xd   :  { %v64_v6 = vsub.f32 1.0, %v58_v2  ;;  %v65_v8 = vsub.f32 1.0, %v59_v3 }
   0xe   :  { %v62_v10 = vmax.f32 %v60_v4, 0.0  ;;  %v63_v11 = vmax.f32 %v61_v5, 0.0 }
   0xf   :  { %v68_v12 = vmul.f32 %v66_v7, %v64_v6  ;;  %v69_v13 = vmul.f32 %v67_v9, %v65_v8 }
  0x10   :  { %v70_v14 = vmul.f32 %v62_v10, %v62_v10  ;;  %v71_v15 = vmul.f32 %v63_v11, %v63_v11 }
  0x12   :  { %v72_v16 = vmul.f32 %v70_v14, %v58_v2  ;;  %v73_v17 = vmul.f32 %v71_v15, %v59_v3 }
  0x14   :  { %v74_v18 = vadd.f32 %v72_v16, %v68_v12  ;;  %v75_v19 = vadd.f32 %v73_v17, %v69_v13 }
  0x16   :  { %v89_v20 = vadd.f32 %v75_v19, %v74_v18 }
  0x18   :  { %90 = vadd.xlane.f32.xlu0 %v89_v20 }
  0x8b   :  { %v91_v21 = vpop.xlane.xlu0 %90 }
  0x8c   :  { %v92_v22 = vrot.slane %v91_v21, 4 }
  0x8e   :  { %v93_v23 = vadd.f32 %v92_v22, %v91_v21 }
  0x90   :  { %v94_v24 = vrot.slane %v93_v23, 2 }
  0x92   :  { %v95_v25 = vadd.f32 %v94_v24, %v93_v23 }
  0x94   :  { %v96_v26 = vrot.slane %v95_v25, 1 }
  0x96   :  { %v97_v27 = vadd.f32 %v96_v26, %v95_v25 }
  0x98   :  { %119 = vpush %v97_v27 }
  0xc9   :  { %s120_s22 = spop %119 }
  0xca   :  { %v99_v28 = vstv %s120_s22 }
  0xcb   :  { %100 = vst [vmem:[#allocation8] sm:$0xff] %v99_v28 }
  0xcc   :  { %111 = dma.vmem_to_hbm [thread:$0]  %s107_s1, 128, %s109_s21, [#allocation5]  }
  0xcd   :  { %200 = dma.done.wait [#allocation5], 128  }
  0xce   :  { %201 = vsyncadd [#allocation5], 4294967168 }
  0xcf   :  { %116 = vsyncpa [#allocation4], 1 }
  0xd0   :  { %117 = vsyncpa [#allocation7], 1 }
  0xd1   :  { %118 = vsyncpa [#allocation5], 1 }

</bundles_post_ra>
